<compile_context>
chip_gen: v7x
topology: tpu7x:2x2x1
jax: 0.10.0
libtpu: 0.0.40
codegen_flags: <defaults>
</compile_context>

<pallas_src>
import math
import jax
import jax.numpy as jnp
from jax.experimental import pallas as pl
from jax.experimental.pallas import tpu as pltpu

# ---- small T5 config ----
D_MODEL = 32
D_KV = 8
N_HEADS = 4
INNER = N_HEADS * D_KV          # 32
SEQ = 8
BATCH = 2
BS = BATCH * SEQ                # 16 -- batch folded into the row axis
NUM_BUCKETS = 32
MAX_DISTANCE = 128
LN_EPS = 1e-6
IS_DECODER = False              # bidirectional relative attention buckets
NEG_INF = -1e9


def _t5_self_attn_kernel(x_ref, ln_w_ref, wqkv_ref, wo_ref, bias_ref, out_ref):
    """Single kernel step over the whole (B*S, D) slab; everything lives in VMEM."""
    xf = x_ref[...].astype(jnp.float32)                           # (BS, D)

    # --- T5LayerNorm: RMS norm (no mean subtraction, no bias), weight scale ---
    var = jnp.mean(xf * xf, axis=-1, keepdims=True)
    normed = xf * jax.lax.rsqrt(var + LN_EPS) * ln_w_ref[...]     # (1,D) broadcast

    # --- fused Q/K/V projection: one (BS,D) @ (D,3*INNER) MXU pass ---
    qkv = jnp.dot(normed, wqkv_ref[...],
                  preferred_element_type=jnp.float32)             # (BS, 3*INNER)

    wo = wo_ref[...]                                              # (INNER, D) hoisted load

    # --- per-head attention (T5: NO 1/sqrt(d_kv) scaling) ---
    # bias_ref[h] is (BS, BS): relative-position bias on same-batch blocks,
    # -1e9 on cross-batch blocks, so the softmax never mixes batch elements.
    o_acc = jnp.zeros((BS, D_MODEL), dtype=jnp.float32)
    for h in range(N_HEADS):                                      # static unroll, H small
        lo = h * D_KV
        qh = qkv[:, lo:lo + D_KV]                                 # (BS, d_kv)
        kh = qkv[:, INNER + lo:INNER + lo + D_KV]
        vh = qkv[:, 2 * INNER + lo:2 * INNER + lo + D_KV]

        # q @ k^T without an explicit transpose (contract the last dims of both).
        s = jax.lax.dot_general(qh, kh, (((1,), (1,)), ((), ())),
                                preferred_element_type=jnp.float32)   # (BS, BS)
        s = s + bias_ref[h]
        s = s - jnp.max(s, axis=-1, keepdims=True)                # XLU reduce (stability)
        p = jnp.exp(s)                                            # cross-batch -> exactly 0
        inv_den = pl.reciprocal(jnp.sum(p, axis=-1, keepdims=True), approx=True)

        ctx = jnp.dot(p, vh, preferred_element_type=jnp.float32)  # (BS, d_kv) unnormalized
        ctx = ctx * inv_den                                       # normalize the small tensor
        # attn @ Wo == sum_h ctx_h @ Wo[h*d_kv:(h+1)*d_kv]  (no concat needed)
        o_acc = o_acc + jnp.dot(ctx, wo[lo:lo + D_KV, :],
                                preferred_element_type=jnp.float32)

    # --- residual add (dropout = identity at inference) ---
    out_ref[...] = (xf + o_acc).astype(out_ref.dtype)


def _block_diag_bias(pos_bias, batch, neg=NEG_INF):
    """(H, S, S) per-head bias -> (H, B*S, B*S) block-diagonal bias with -1e9 off-diag."""
    H, S, _ = pos_bias.shape
    tiled = jnp.tile(pos_bias, (1, batch, batch))                 # (H, B*S, B*S)
    same_batch = jnp.kron(jnp.eye(batch, dtype=jnp.float32),
                          jnp.ones((S, S), dtype=jnp.float32)).astype(bool)
    return jnp.where(same_batch[None], tiled, jnp.float32(neg))


def compute_position_bias(rel_emb, q_len, k_len, bidirectional=True,
                          num_buckets=NUM_BUCKETS, max_distance=MAX_DISTANCE):
    """Plain-JAX glue reproducing MyT5Attention.compute_bias (-> (H, q_len, k_len))."""
    ctx = jnp.arange(q_len, dtype=jnp.int32)[:, None]
    mem = jnp.arange(k_len, dtype=jnp.int32)[None, :]
    rel = mem - ctx                                               # memory - query
    rb = jnp.zeros_like(rel)
    if bidirectional:
        num_buckets = num_buckets // 2
        rb = rb + (rel > 0).astype(jnp.int32) * num_buckets
        rel = jnp.abs(rel)
    else:
        rel = -jnp.minimum(rel, jnp.zeros_like(rel))
    max_exact = num_buckets // 2
    is_small = rel < max_exact
    # clamp before the log so rel==0 never produces -inf (result is masked anyway)
    rel_f = jnp.maximum(rel, 1).astype(jnp.float32)
    large = max_exact + (jnp.log(rel_f / max_exact) / math.log(max_distance / max_exact)
                         * (num_buckets - max_exact)).astype(jnp.int32)
    large = jnp.minimum(large, num_buckets - 1)
    rb = rb + jnp.where(is_small, rel, large)
    values = rel_emb[rb]                                          # (q, k, H)
    return jnp.transpose(values, (2, 0, 1))                       # (H, q, k)


def t5_layer_self_attention(hidden_states, ln_w, wq_t, wk_t, wv_t, wo_t, pos_bias):
    B, S, D = hidden_states.shape
    x2d = hidden_states.reshape(B * S, D)                         # free (metadata) reshape
    wqkv = jnp.concatenate([wq_t, wk_t, wv_t], axis=1)            # (D, 3*INNER)
    bias_bd = _block_diag_bias(pos_bias, B)                       # (H, B*S, B*S)

    out2d = pl.pallas_call(
        _t5_self_attn_kernel,
        out_shape=jax.ShapeDtypeStruct((B * S, D), hidden_states.dtype),
        in_specs=[
            pl.BlockSpec(memory_space=pltpu.MemorySpace.VMEM),    # hidden (B*S, D)
            pl.BlockSpec(memory_space=pltpu.MemorySpace.VMEM),    # layer-norm weight (1, D)
            pl.BlockSpec(memory_space=pltpu.MemorySpace.VMEM),    # Wqkv^T (D, 3*INNER)
            pl.BlockSpec(memory_space=pltpu.MemorySpace.VMEM),    # Wo^T (INNER, D)
            pl.BlockSpec(memory_space=pltpu.MemorySpace.VMEM),    # block-diag pos bias
        ],
        out_specs=pl.BlockSpec(memory_space=pltpu.MemorySpace.VMEM),
    )(x2d, ln_w, wqkv, wo_t, bias_bd)
    return out2d.reshape(B, S, D)


def reference(hidden, ln_w, wq_t, wk_t, wv_t, wo_t, pos_bias):
    """Pure-JAX reference mirroring the PyTorch forward."""
    B, S, D = hidden.shape
    xf = hidden.astype(jnp.float32)
    var = jnp.mean(xf * xf, axis=-1, keepdims=True)
    normed = xf * jax.lax.rsqrt(var + LN_EPS) * ln_w              # T5LayerNorm
    q = (normed @ wq_t).reshape(B, S, N_HEADS, D_KV).transpose(0, 2, 1, 3)
    k = (normed @ wk_t).reshape(B, S, N_HEADS, D_KV).transpose(0, 2, 1, 3)
    v = (normed @ wv_t).reshape(B, S, N_HEADS, D_KV).transpose(0, 2, 1, 3)
    scores = jnp.einsum('bhqd,bhkd->bhqk', q, k) + pos_bias[None]
    attn = jax.nn.softmax(scores.astype(jnp.float32), axis=-1)
    ctx = jnp.einsum('bhqk,bhkd->bhqd', attn, v)
    ctx = ctx.transpose(0, 2, 1, 3).reshape(B, S, INNER)
    return hidden + ctx @ wo_t


if __name__ == "__main__":
    key = jax.random.PRNGKey(0)
    k_x, k_ln, k_q, k_k, k_v, k_o, k_e = jax.random.split(key, 7)

    hidden = jax.random.normal(k_x, (BATCH, SEQ, D_MODEL), dtype=jnp.float32)

    # Parameters (deterministic, synthetic). Linear weights stored pre-transposed
    # to (in_features, out_features) so the kernel computes x @ W.
    ln_w = (1.0 + 0.1 * jax.random.normal(k_ln, (1, D_MODEL))).astype(jnp.float32)
    wq_t = 0.05 * jax.random.normal(k_q, (D_MODEL, INNER), dtype=jnp.float32)
    wk_t = 0.05 * jax.random.normal(k_k, (D_MODEL, INNER), dtype=jnp.float32)
    wv_t = 0.05 * jax.random.normal(k_v, (D_MODEL, INNER), dtype=jnp.float32)
    wo_t = 0.05 * jax.random.normal(k_o, (INNER, D_MODEL), dtype=jnp.float32)
    rel_emb = 0.1 * jax.random.normal(k_e, (NUM_BUCKETS, N_HEADS), dtype=jnp.float32)

    # has_relative_attention_bias=True path; attention_mask=None, past_key_value=None.
    pos_bias = compute_position_bias(rel_emb, SEQ, SEQ, bidirectional=not IS_DECODER)

    out = t5_layer_self_attention(hidden, ln_w, wq_t, wk_t, wv_t, wo_t, pos_bias)
    out = jax.block_until_ready(out)

    ref = reference(hidden, ln_w[0], wq_t, wk_t, wv_t, wo_t, pos_bias)
    # Tolerance slightly looser than exact-f32 because the in-kernel softmax uses
    # the EUP approximate reciprocal (pl.reciprocal(..., approx=True)).
    assert jnp.allclose(out, ref, atol=2e-3, rtol=2e-3), "mismatch vs reference"

    # Module also returns (present_key_value_state=None, position_bias) — glue outputs,
    # not part of the kernel hot path.
    print("KERNEL_OK")
</pallas_src>

<mosaic_0001>
module attributes {stable_mosaic.version = 11 : i64} {
  func.func @_t5_self_attn_kernel(%arg0: memref<16x32xf32, #tpu.memory_space<vmem>>, %arg1: memref<1x32xf32, #tpu.memory_space<vmem>>, %arg2: memref<32x96xf32, #tpu.memory_space<vmem>>, %arg3: memref<32x32xf32, #tpu.memory_space<vmem>>, %arg4: memref<4x16x16xf32, #tpu.memory_space<vmem>>, %arg5: memref<16x32xf32, #tpu.memory_space<vmem>>) attributes {dimension_semantics = [], scalar_prefetch = 0 : i64, scratch_operands = 0 : i64, tpu.core_type = #tpu.core_type<tc>} {
    %c0 = arith.constant 0 : index
    %c0_0 = arith.constant 0 : index
    %0 = vector.load %arg0[%c0, %c0_0] : memref<16x32xf32, #tpu.memory_space<vmem>>, vector<16x32xf32>
    %1 = arith.mulf %0, %0 : vector<16x32xf32>
    %cst = arith.constant dense<0.000000e+00> : vector<16xf32>
    %2 = vector.multi_reduction <add>, %1, %cst [1] : vector<16x32xf32> to vector<16xf32>
    %3 = vector.shape_cast %2 : vector<16xf32> to vector<16x1xf32>
    %cst_1 = arith.constant 3.200000e+01 : f32
    %4 = vector.broadcast %cst_1 : f32 to vector<16x1xf32>
    %5 = arith.divf %3, %4 : vector<16x1xf32>
    %cst_2 = arith.constant 9.99999997E-7 : f32
    %6 = vector.broadcast %cst_2 : f32 to vector<16x1xf32>
    %7 = arith.addf %5, %6 : vector<16x1xf32>
    %8 = math.rsqrt %7 : vector<16x1xf32>
    %9 = vector.broadcast %8 : vector<16x1xf32> to vector<16x32xf32>
    %10 = arith.mulf %0, %9 : vector<16x32xf32>
    %c0_3 = arith.constant 0 : index
    %c0_4 = arith.constant 0 : index
    %11 = vector.load %arg1[%c0_3, %c0_4] : memref<1x32xf32, #tpu.memory_space<vmem>>, vector<1x32xf32>
    %12 = vector.broadcast %11 : vector<1x32xf32> to vector<16x32xf32>
    %13 = arith.mulf %10, %12 : vector<16x32xf32>
    %c0_5 = arith.constant 0 : index
    %c0_6 = arith.constant 0 : index
    %14 = vector.load %arg2[%c0_5, %c0_6] : memref<32x96xf32, #tpu.memory_space<vmem>>, vector<32x96xf32>
    %cst_7 = arith.constant dense<0.000000e+00> : vector<16x96xf32>
    %15 = tpu.matmul %13, %14, %cst_7 {dimension_numbers = #tpu.dot_dimension_numbers<[1], [0], [0], [1], [0, 0, 1, 1], [], []>} : vector<16x32xf32>, vector<32x96xf32>, vector<16x96xf32> -> vector<16x96xf32>
    %c0_8 = arith.constant 0 : index
    %c0_9 = arith.constant 0 : index
    %16 = vector.load %arg3[%c0_8, %c0_9] : memref<32x32xf32, #tpu.memory_space<vmem>>, vector<32x32xf32>
    %cst_10 = arith.constant 0.000000e+00 : f32
    %17 = vector.broadcast %cst_10 : f32 to vector<16x32xf32>
    %18 = vector.extract_strided_slice %15 {offsets = [0, 0], sizes = [16, 8], strides = [1, 1]} : vector<16x96xf32> to vector<16x8xf32>
    %19 = vector.extract_strided_slice %15 {offsets = [0, 32], sizes = [16, 8], strides = [1, 1]} : vector<16x96xf32> to vector<16x8xf32>
    %20 = vector.extract_strided_slice %15 {offsets = [0, 64], sizes = [16, 8], strides = [1, 1]} : vector<16x96xf32> to vector<16x8xf32>
    %cst_11 = arith.constant dense<0.000000e+00> : vector<16x16xf32>
    %21 = tpu.matmul %18, %19, %cst_11 {dimension_numbers = #tpu.dot_dimension_numbers<[1], [1], [0], [0], [0, 0, 1, 0], [], []>} : vector<16x8xf32>, vector<16x8xf32>, vector<16x16xf32> -> vector<16x16xf32>
    %c0_12 = arith.constant 0 : index
    %c0_13 = arith.constant 0 : index
    %c0_14 = arith.constant 0 : index
    %22 = vector.load %arg4[%c0_12, %c0_13, %c0_14] : memref<4x16x16xf32, #tpu.memory_space<vmem>>, vector<1x16x16xf32>
    %23 = vector.shape_cast %22 : vector<1x16x16xf32> to vector<16x16xf32>
    %24 = arith.addf %21, %23 : vector<16x16xf32>
    %cst_15 = arith.constant dense<0xFF800000> : vector<16xf32>
    %25 = vector.multi_reduction <maximumf>, %24, %cst_15 [1] : vector<16x16xf32> to vector<16xf32>
    %26 = vector.shape_cast %25 : vector<16xf32> to vector<16x1xf32>
    %27 = vector.broadcast %26 : vector<16x1xf32> to vector<16x16xf32>
    %28 = arith.subf %24, %27 : vector<16x16xf32>
    %29 = math.exp %28 : vector<16x16xf32>
    %cst_16 = arith.constant dense<0.000000e+00> : vector<16xf32>
    %30 = vector.multi_reduction <add>, %29, %cst_16 [1] : vector<16x16xf32> to vector<16xf32>
    %31 = vector.shape_cast %30 : vector<16xf32> to vector<16x1xf32>
    %32 = tpu.reciprocal %31 {approx = true} : vector<16x1xf32> -> vector<16x1xf32>
    %cst_17 = arith.constant dense<0.000000e+00> : vector<16x8xf32>
    %33 = tpu.matmul %29, %20, %cst_17 {dimension_numbers = #tpu.dot_dimension_numbers<[1], [0], [0], [1], [0, 0, 1, 1], [], []>} : vector<16x16xf32>, vector<16x8xf32>, vector<16x8xf32> -> vector<16x8xf32>
    %34 = vector.broadcast %32 : vector<16x1xf32> to vector<16x8xf32>
    %35 = arith.mulf %33, %34 : vector<16x8xf32>
    %36 = vector.extract_strided_slice %16 {offsets = [0, 0], sizes = [8, 32], strides = [1, 1]} : vector<32x32xf32> to vector<8x32xf32>
    %cst_18 = arith.constant dense<0.000000e+00> : vector<16x32xf32>
    %37 = tpu.matmul %35, %36, %cst_18 {dimension_numbers = #tpu.dot_dimension_numbers<[1], [0], [0], [1], [0, 0, 1, 1], [], []>} : vector<16x8xf32>, vector<8x32xf32>, vector<16x32xf32> -> vector<16x32xf32>
    %38 = arith.addf %17, %37 : vector<16x32xf32>
    %39 = vector.extract_strided_slice %15 {offsets = [0, 8], sizes = [16, 8], strides = [1, 1]} : vector<16x96xf32> to vector<16x8xf32>
    %40 = vector.extract_strided_slice %15 {offsets = [0, 40], sizes = [16, 8], strides = [1, 1]} : vector<16x96xf32> to vector<16x8xf32>
    %41 = vector.extract_strided_slice %15 {offsets = [0, 72], sizes = [16, 8], strides = [1, 1]} : vector<16x96xf32> to vector<16x8xf32>
    %cst_19 = arith.constant dense<0.000000e+00> : vector<16x16xf32>
    %42 = tpu.matmul %39, %40, %cst_19 {dimension_numbers = #tpu.dot_dimension_numbers<[1], [1], [0], [0], [0, 0, 1, 0], [], []>} : vector<16x8xf32>, vector<16x8xf32>, vector<16x16xf32> -> vector<16x16xf32>
    %c1 = arith.constant 1 : index
    %c0_20 = arith.constant 0 : index
    %c0_21 = arith.constant 0 : index
    %43 = vector.load %arg4[%c1, %c0_20, %c0_21] : memref<4x16x16xf32, #tpu.memory_space<vmem>>, vector<1x16x16xf32>
    %44 = vector.shape_cast %43 : vector<1x16x16xf32> to vector<16x16xf32>
    %45 = arith.addf %42, %44 : vector<16x16xf32>
    %cst_22 = arith.constant dense<0xFF800000> : vector<16xf32>
    %46 = vector.multi_reduction <maximumf>, %45, %cst_22 [1] : vector<16x16xf32> to vector<16xf32>
    %47 = vector.shape_cast %46 : vector<16xf32> to vector<16x1xf32>
    %48 = vector.broadcast %47 : vector<16x1xf32> to vector<16x16xf32>
    %49 = arith.subf %45, %48 : vector<16x16xf32>
    %50 = math.exp %49 : vector<16x16xf32>
    %cst_23 = arith.constant dense<0.000000e+00> : vector<16xf32>
    %51 = vector.multi_reduction <add>, %50, %cst_23 [1] : vector<16x16xf32> to vector<16xf32>
    %52 = vector.shape_cast %51 : vector<16xf32> to vector<16x1xf32>
    %53 = tpu.reciprocal %52 {approx = true} : vector<16x1xf32> -> vector<16x1xf32>
    %cst_24 = arith.constant dense<0.000000e+00> : vector<16x8xf32>
    %54 = tpu.matmul %50, %41, %cst_24 {dimension_numbers = #tpu.dot_dimension_numbers<[1], [0], [0], [1], [0, 0, 1, 1], [], []>} : vector<16x16xf32>, vector<16x8xf32>, vector<16x8xf32> -> vector<16x8xf32>
    %55 = vector.broadcast %53 : vector<16x1xf32> to vector<16x8xf32>
    %56 = arith.mulf %54, %55 : vector<16x8xf32>
    %57 = vector.extract_strided_slice %16 {offsets = [8, 0], sizes = [8, 32], strides = [1, 1]} : vector<32x32xf32> to vector<8x32xf32>
    %cst_25 = arith.constant dense<0.000000e+00> : vector<16x32xf32>
    %58 = tpu.matmul %56, %57, %cst_25 {dimension_numbers = #tpu.dot_dimension_numbers<[1], [0], [0], [1], [0, 0, 1, 1], [], []>} : vector<16x8xf32>, vector<8x32xf32>, vector<16x32xf32> -> vector<16x32xf32>
    %59 = arith.addf %38, %58 : vector<16x32xf32>
    %60 = vector.extract_strided_slice %15 {offsets = [0, 16], sizes = [16, 8], strides = [1, 1]} : vector<16x96xf32> to vector<16x8xf32>
    %61 = vector.extract_strided_slice %15 {offsets = [0, 48], sizes = [16, 8], strides = [1, 1]} : vector<16x96xf32> to vector<16x8xf32>
    %62 = vector.extract_strided_slice %15 {offsets = [0, 80], sizes = [16, 8], strides = [1, 1]} : vector<16x96xf32> to vector<16x8xf32>
    %cst_26 = arith.constant dense<0.000000e+00> : vector<16x16xf32>
    %63 = tpu.matmul %60, %61, %cst_26 {dimension_numbers = #tpu.dot_dimension_numbers<[1], [1], [0], [0], [0, 0, 1, 0], [], []>} : vector<16x8xf32>, vector<16x8xf32>, vector<16x16xf32> -> vector<16x16xf32>
    %c2 = arith.constant 2 : index
    %c0_27 = arith.constant 0 : index
    %c0_28 = arith.constant 0 : index
    %64 = vector.load %arg4[%c2, %c0_27, %c0_28] : memref<4x16x16xf32, #tpu.memory_space<vmem>>, vector<1x16x16xf32>
    %65 = vector.shape_cast %64 : vector<1x16x16xf32> to vector<16x16xf32>
    %66 = arith.addf %63, %65 : vector<16x16xf32>
    %cst_29 = arith.constant dense<0xFF800000> : vector<16xf32>
    %67 = vector.multi_reduction <maximumf>, %66, %cst_29 [1] : vector<16x16xf32> to vector<16xf32>
    %68 = vector.shape_cast %67 : vector<16xf32> to vector<16x1xf32>
    %69 = vector.broadcast %68 : vector<16x1xf32> to vector<16x16xf32>
    %70 = arith.subf %66, %69 : vector<16x16xf32>
    %71 = math.exp %70 : vector<16x16xf32>
    %cst_30 = arith.constant dense<0.000000e+00> : vector<16xf32>
    %72 = vector.multi_reduction <add>, %71, %cst_30 [1] : vector<16x16xf32> to vector<16xf32>
    %73 = vector.shape_cast %72 : vector<16xf32> to vector<16x1xf32>
    %74 = tpu.reciprocal %73 {approx = true} : vector<16x1xf32> -> vector<16x1xf32>
    %cst_31 = arith.constant dense<0.000000e+00> : vector<16x8xf32>
    %75 = tpu.matmul %71, %62, %cst_31 {dimension_numbers = #tpu.dot_dimension_numbers<[1], [0], [0], [1], [0, 0, 1, 1], [], []>} : vector<16x16xf32>, vector<16x8xf32>, vector<16x8xf32> -> vector<16x8xf32>
    %76 = vector.broadcast %74 : vector<16x1xf32> to vector<16x8xf32>
    %77 = arith.mulf %75, %76 : vector<16x8xf32>
    %78 = vector.extract_strided_slice %16 {offsets = [16, 0], sizes = [8, 32], strides = [1, 1]} : vector<32x32xf32> to vector<8x32xf32>
    %cst_32 = arith.constant dense<0.000000e+00> : vector<16x32xf32>
    %79 = tpu.matmul %77, %78, %cst_32 {dimension_numbers = #tpu.dot_dimension_numbers<[1], [0], [0], [1], [0, 0, 1, 1], [], []>} : vector<16x8xf32>, vector<8x32xf32>, vector<16x32xf32> -> vector<16x32xf32>
    %80 = arith.addf %59, %79 : vector<16x32xf32>
    %81 = vector.extract_strided_slice %15 {offsets = [0, 24], sizes = [16, 8], strides = [1, 1]} : vector<16x96xf32> to vector<16x8xf32>
    %82 = vector.extract_strided_slice %15 {offsets = [0, 56], sizes = [16, 8], strides = [1, 1]} : vector<16x96xf32> to vector<16x8xf32>
    %83 = vector.extract_strided_slice %15 {offsets = [0, 88], sizes = [16, 8], strides = [1, 1]} : vector<16x96xf32> to vector<16x8xf32>
    %cst_33 = arith.constant dense<0.000000e+00> : vector<16x16xf32>
    %84 = tpu.matmul %81, %82, %cst_33 {dimension_numbers = #tpu.dot_dimension_numbers<[1], [1], [0], [0], [0, 0, 1, 0], [], []>} : vector<16x8xf32>, vector<16x8xf32>, vector<16x16xf32> -> vector<16x16xf32>
    %c3 = arith.constant 3 : index
    %c0_34 = arith.constant 0 : index
    %c0_35 = arith.constant 0 : index
    %85 = vector.load %arg4[%c3, %c0_34, %c0_35] : memref<4x16x16xf32, #tpu.memory_space<vmem>>, vector<1x16x16xf32>
    %86 = vector.shape_cast %85 : vector<1x16x16xf32> to vector<16x16xf32>
    %87 = arith.addf %84, %86 : vector<16x16xf32>
    %cst_36 = arith.constant dense<0xFF800000> : vector<16xf32>
    %88 = vector.multi_reduction <maximumf>, %87, %cst_36 [1] : vector<16x16xf32> to vector<16xf32>
    %89 = vector.shape_cast %88 : vector<16xf32> to vector<16x1xf32>
    %90 = vector.broadcast %89 : vector<16x1xf32> to vector<16x16xf32>
    %91 = arith.subf %87, %90 : vector<16x16xf32>
    %92 = math.exp %91 : vector<16x16xf32>
    %cst_37 = arith.constant dense<0.000000e+00> : vector<16xf32>
    %93 = vector.multi_reduction <add>, %92, %cst_37 [1] : vector<16x16xf32> to vector<16xf32>
    %94 = vector.shape_cast %93 : vector<16xf32> to vector<16x1xf32>
    %95 = tpu.reciprocal %94 {approx = true} : vector<16x1xf32> -> vector<16x1xf32>
    %cst_38 = arith.constant dense<0.000000e+00> : vector<16x8xf32>
    %96 = tpu.matmul %92, %83, %cst_38 {dimension_numbers = #tpu.dot_dimension_numbers<[1], [0], [0], [1], [0, 0, 1, 1], [], []>} : vector<16x16xf32>, vector<16x8xf32>, vector<16x8xf32> -> vector<16x8xf32>
    %97 = vector.broadcast %95 : vector<16x1xf32> to vector<16x8xf32>
    %98 = arith.mulf %96, %97 : vector<16x8xf32>
    %99 = vector.extract_strided_slice %16 {offsets = [24, 0], sizes = [8, 32], strides = [1, 1]} : vector<32x32xf32> to vector<8x32xf32>
    %cst_39 = arith.constant dense<0.000000e+00> : vector<16x32xf32>
    %100 = tpu.matmul %98, %99, %cst_39 {dimension_numbers = #tpu.dot_dimension_numbers<[1], [0], [0], [1], [0, 0, 1, 1], [], []>} : vector<16x8xf32>, vector<8x32xf32>, vector<16x32xf32> -> vector<16x32xf32>
    %101 = arith.addf %80, %100 : vector<16x32xf32>
    %102 = arith.addf %0, %101 : vector<16x32xf32>
    %c0_40 = arith.constant 0 : index
    %c0_41 = arith.constant 0 : index
    %103 = vector.load %arg5[%c0_40, %c0_41] : memref<16x32xf32, #tpu.memory_space<vmem>>, vector<16x32xf32>
    tpu.vector_store %arg5[%c0_40, %c0_41], %102 {strides = array<i32>} : memref<16x32xf32, #tpu.memory_space<vmem>>, vector<16x32xf32>,
    return
  }
}

</mosaic_0001>

<bundles_post_ra>
// kernel: tpu_custom_call.1
= control target key start
LH: loop header
LB: loop body
LE: loop exit
PB: predicated region body
PF: predicated region fallthrough
CT: control target
= control target key end

     0   :  { %10 = vsyncpa [#allocation3], 0  ;;  %s2044_s0 = inlined_call_operand.hbm [shape: f32[16,32], index: 0, kind: input, shape index: {}]   ;;  %s2045_s1 = inlined_call_operand.vmem [shape: f32[1,32], index: 1, kind: input, shape index: {}]   ;;  %s2046_s2 = inlined_call_operand.hbm [shape: f32[32,96], index: 2, kind: input, shape index: {}]   ;;  %s2047_s3 = inlined_call_operand.hbm [shape: f32[32,32], index: 3, kind: input, shape index: {}]   ;;  %s2048_s4 = inlined_call_operand.hbm [shape: f32[4,16,16], index: 4, kind: input, shape index: {}]   ;;  %s2049_s5 = inlined_call_operand.hbm [shape: f32[16,32], index: 5, kind: output, shape index: {}]  }
   0x1   :  { %11 = vsyncpa [#allocation6], 0 }
   0x2   :  { %12 = vsyncpa [#allocation9], 0 }
   0x3   :  { %13 = vsyncpa [#allocation4], 0  ;;  %s1794_s18 = smov [#allocation5]   ;;  %s1795_s20 = smov [#allocation2]  }
   0x4   :  { %s33_s19 = sshll.u32 %s1794_s18, 4  ;;  %s19_s21 = sshll.u32 %s1795_s20, 4  ;;  %s34_s19 = int_to_ptr.vmem [resolvable:$true] %s33_s19  ;;  %s1842_s21 = int_to_ptr.vmem [resolvable:$true] %s19_s21 }
   0x5   :  { %s1676_s24 = scalar_lea.hbm %s2046_s2, 512 }
   0x6   :  { %p1677_p0 = scmp.ne.s32.totalorder %s2046_s2, %s1676_s24  ;;  %p1680_p1 = scmp.lt.u32.totalorder %s1676_s24, %s2046_s2 }
   0x8   :  { %p1682_p2 = pnand %p1680_p1, %p1677_p0 }
   0xa   :  { %1685 = shalt.err (!%p1682_p2)
}
   0xb   :  { %s1686_s29 = scalar_lea.vmem %s34_s19, 512  ;;  %p1691_p4 = scmp.lt.s32.totalorder %s34_s19, %s34_s19 }
   0xc   :  { %p1687_p3 = scmp.ne.s32.totalorder %s34_s19, %s1686_s29  ;;  %p1692_p5 = scmp.lt.s32.totalorder %s1686_s29, %s1686_s29 }
   0xe   :  { %p1693_p6 = por %p1692_p5, %p1691_p4 }
  0x10   :  { %p1694_p7 = pnand %p1693_p6, %p1687_p3 }
  0x12   :  { %1697 = shalt.err (!%p1694_p7)
}
  0x13   :  { %s1796_s30 = smov 128   ;;  %s1797_s6 = smov 8  }
  0x14   :  { %39 = dma.hbm_to_vmem [thread:$0]  %s2046_s2, 512, %s34_s19, [#allocation6], %s1796_s30, %s1796_s30, %s1797_s6  }
  0x15   :  { %s1698_s11 = scalar_lea.hbm %s2044_s0, 256 }
  0x16   :  { %p1699_p8 = scmp.ne.s32.totalorder %s2044_s0, %s1698_s11  ;;  %p1702_p9 = scmp.lt.u32.totalorder %s1698_s11, %s2044_s0 }
  0x18   :  { %p1704_p10 = pnand %p1702_p9, %p1699_p8 }
  0x1a   :  { %1707 = shalt.err (!%p1704_p10)
}
  0x1b   :  { %s1708_s16 = scalar_lea.vmem %s1842_s21, 256  ;;  %p1713_p12 = scmp.lt.s32.totalorder %s1842_s21, %s1842_s21 }
  0x1c   :  { %p1709_p11 = scmp.ne.s32.totalorder %s1842_s21, %s1708_s16  ;;  %p1714_p13 = scmp.lt.s32.totalorder %s1708_s16, %s1708_s16 }
  0x1e   :  { %p1715_p0 = por %p1714_p13, %p1713_p12 }
  0x20   :  { %p1716_p1 = pnand %p1715_p0, %p1709_p11 }
  0x22   :  { %1719 = shalt.err (!%p1716_p1)
}
  0x23   :  { %25 = dma.hbm_to_vmem [thread:$0]  %s2044_s0, 256, %s1842_s21, [#allocation3], %s1796_s30, %s1796_s30, %s1797_s6  }
  0x24   :  { %s1798_s18 = smov [#allocation7]   ;;  %s1799_s20 = smov [#allocation8]  }
  0x25   :  { %s45_s19 = sshll.u32 %s1798_s18, 4  ;;  %s57_s22 = sshll.u32 %s1799_s20, 4  ;;  %s46_s19 = int_to_ptr.vmem [resolvable:$true] %s45_s19  ;;  %s1879_s22 = int_to_ptr.vmem [resolvable:$true] %s57_s22 }
  0x26   :  { %s1720_s25 = scalar_lea.hbm %s2047_s3, 512 }
  0x27   :  { %p1721_p2 = scmp.ne.s32.totalorder %s2047_s3, %s1720_s25  ;;  %p1724_p3 = scmp.lt.u32.totalorder %s1720_s25, %s2047_s3 }
  0x29   :  { %p1726_p4 = pnand %p1724_p3, %p1721_p2 }
  0x2b   :  { %1729 = shalt.err (!%p1726_p4)
}
  0x2c   :  { %s1730_s0 = scalar_lea.vmem %s46_s19, 512  ;;  %p1735_p6 = scmp.lt.s32.totalorder %s46_s19, %s46_s19 }
  0x2d   :  { %p1731_p5 = scmp.ne.s32.totalorder %s46_s19, %s1730_s0  ;;  %p1736_p7 = scmp.lt.s32.totalorder %s1730_s0, %s1730_s0 }
  0x2f   :  { %p1737_p8 = por %p1736_p7, %p1735_p6 }
  0x31   :  { %p1738_p9 = pnand %p1737_p8, %p1731_p5 }
  0x33   :  { %1741 = shalt.err (!%p1738_p9)
}
  0x34   :  { %51 = dma.hbm_to_vmem [thread:$0]  %s2047_s3, 512, %s46_s19, [#allocation6], %s1796_s30, %s1796_s30, %s1797_s6  }
  0x35   :  { %s1742_s10 = scalar_lea.hbm %s2048_s4, 1024 }
  0x36   :  { %p1743_p10 = scmp.ne.s32.totalorder %s2048_s4, %s1742_s10  ;;  %p1746_p11 = scmp.lt.u32.totalorder %s1742_s10, %s2048_s4 }
  0x38   :  { %p1748_p12 = pnand %p1746_p11, %p1743_p10 }
  0x3a   :  { %1751 = shalt.err (!%p1748_p12)
}
  0x3b   :  { %s1752_s15 = scalar_lea.vmem %s1879_s22, 1024  ;;  %p1757_p0 = scmp.lt.s32.totalorder %s1879_s22, %s1879_s22 }
  0x3c   :  { %p1753_p13 = scmp.ne.s32.totalorder %s1879_s22, %s1752_s15  ;;  %p1758_p1 = scmp.lt.s32.totalorder %s1752_s15, %s1752_s15 }
  0x3e   :  { %p1759_p2 = por %p1758_p1, %p1757_p0 }
  0x40   :  { %p1760_p3 = pnand %p1759_p2, %p1753_p13 }
  0x42   :  { %1763 = shalt.err (!%p1760_p3)
}
  0x43   :  { %63 = dma.hbm_to_vmem [thread:$0]  %s2048_s4, 1024, %s1879_s22, [#allocation9], %s1796_s30, %s1796_s30, %s1797_s6  }
  0x44   :  { %1786 = dma.done.wait [#allocation3], 256  }
  0x45   :  { %1787 = vsyncadd [#allocation3], 4294967040 }
  0x46   :  { %1788 = dma.done.wait [#allocation6], 1024  }
  0x47   :  { %1789 = vsyncadd [#allocation6], 4294966272 }
  0x48   :  { %1790 = dma.done.wait [#allocation9], 1024  }
  0x49   :  { %1791 = vsyncadd [#allocation9], 4294966272  ;;  %v1916_v0 = vld [vmem:[#allocation2] sm:$0xff]  ;;  %vm80_vm0 = vcmask 261120   ;;  %v1918_v1 = vld [vmem:[#allocation2 + $0x8] sm:$0xff]  ;;  %vm202_vm1 = vcmask 64512  }
  0x4a   :  { %v78_v2 = vmul.f32 %v1916_v0, %v1916_v0  ;;  %v79_v3 = vmul.f32 %v1918_v1, %v1918_v1  ;;  %v105_v6 = vld [vmem:[#allocation5] sm:$0xff]  ;;  %v106_v7 = vld [vmem:[#allocation5 + $0x8] sm:$0xff]  ;;  %v107_v8 = vld [vmem:[#allocation5 + $0x10] sm:$0xff]  ;;  %vm286_vm3 = vcmask 130048   ;;  %s1801_s17 = smov 120   ;;  %s1802_s18 = smov 64  }
  0x4b   :  { %v1528_v9 = vpack.c.bf16 %v106_v7, %v105_v6  ;;  %v108_v10 = vld [vmem:[#allocation5 + $0x18] sm:$0xff]  ;;  %v1356_v19 = vld [vmem:[%s2045_s1] ss:$0 sm:$0xff]  ;;  %s1800_s1 = smov 96   ;;  %vm1946_vm2 = vmpackc.low %vm202_vm1, %vm202_vm1  ;;  %s1803_s19 = smov 88  }
  0x4c   :  { %v81_v4 = vsel %vm80_vm0, %v78_v2, 0.0  ;;  %v84_v5 = vsel %vm80_vm0, %v79_v3, 0.0  ;;  %v1532_v11 = vpack.c.bf16 %v108_v10, %v107_v8  ;;  %v195_v33 = vld [vmem:[#allocation8 + $0x8] sm:$0xff]  ;;  %v194_v34 = vld [vmem:[#allocation8] sm:$0xff]  ;;  %s1804_s20 = smov 80   ;;  %s1805_s22 = smov 112  }
  0x4d   :  { %82 = vadd.xlane.f32.xlu0 %v81_v4  ;;  %1529 = vmatprep.subr.bf16.mxu0 %v1528_v9  ;;  %v397_v6 = vld [vmem:[#allocation8 + $0x10] sm:$0xff]  ;;  %s1806_s23 = smov 72   ;;  %s1807_s24 = smov 104  }
  0x4e   :  { %1531 = vmatpush3.bf16.msra.mxu0 %v1528_v9  ;;  %s1808_s25 = smov 56   ;;  %s1809_s26 = smov 48  }
  0x4f   :  { %1533 = vmatprep.subr.bf16.mxu0 %v1532_v11  ;;  %s1810_s27 = smov 40   ;;  %s1811_s28 = smov [#allocation10]  }
  0x50   :  { %s1342_s29 = sshll.u32 %s1811_s28, 4  ;;  %s1343_s29 = int_to_ptr.vmem [resolvable:$true] %s1342_s29 }
  0x51   :  { %85 = vadd.xlane.f32.xlu0 %v84_v5  ;;  %v398_v5 = vld [vmem:[#allocation8 + $0x18] sm:$0xff]  ;;  %s1764_s0 = scalar_lea.vmem %s1343_s29, 256  ;;  %p1769_p5 = scmp.lt.s32.totalorder %s1343_s29, %s1343_s29 }
  0x52   :  { %1535 = vmatpush3.bf16.msra.mxu0 %v1532_v11  ;;  %p1765_p4 = scmp.ne.s32.totalorder %s1343_s29, %s1764_s0  ;;  %p1770_p6 = scmp.lt.s32.totalorder %s1764_s0, %s1764_s0 }
  0x54   :  { %p1771_p7 = por %p1770_p6, %p1769_p5 }
  0x56   :  { %p1772_p8 = pnand %p1771_p7, %p1765_p4 }
  0xda   :  { %v83_v12 = vpop.xlane.xlu0 %82 }
  0xdb   :  { %v88_v13 = vmul.f32 0.03125, %v83_v12 }
  0xdd   :  { %v90_v14 = vadd.f32 1e-06, %v88_v13 }
  0xde   :  { %v86_v15 = vpop.xlane.xlu0 %85 }
  0xdf   :  { %1640 = vrsqrt.f32 %v90_v14  ;;  %v89_v16 = vmul.f32 0.03125, %v86_v15 }
  0xe1   :  { %v91_v17 = vadd.f32 1e-06, %v89_v16 }
  0xe3   :  { %1642 = vrsqrt.f32 %v91_v17 }
  0xe9   :  { %v1641_v18 = vpop.eup %1640 }
  0xea   :  { %v94_v20 = vmul.f32 %v1641_v18, %v1916_v0 }
  0xec   :  { %v103_v21 = vmul.f32 %v1356_v19, %v94_v20 }
  0xed   :  { %v1643_v22 = vpop.eup %1642 }
  0xee   :  { %v95_v23 = vmul.f32 %v1643_v22, %v1918_v1  ;;  %1449 = vmatprep.mubr.msk.f32.mxu0 %vm80_vm0, %v103_v21 }
  0xf0   :  { %v104_v24 = vmul.f32 %v1356_v19, %v95_v23 }
  0xf2   :  { %1450 = vmatmul.mubr.msk.f32.vlgmr.msra.gmra.mrb[0].mxu0 %vm80_vm0, %v104_v24 }
 0x1c5   :  { %v1933_v25 = vpop.f32.mrb[0].mxu0 }
 0x1c6   :  { %v1935_v26 = vpop.f32.mrb[1].mxu0 }
 0x1c7   :  { %1456 = vmatprep.mubr.msk.f32.mxu1 %vm202_vm1, %v1935_v26  ;;  %v1941_v27 = vpack.i.bf16 %v1933_v25, %v1935_v26 }
 0x1c9   :  { %1601 = vrot.lane.b32.xlu1 %v1941_v27, %s1800_s1 }
 0x23b   :  { %v1602_v28 = vpop.permute.xlu1 %1601 }
 0x23c   :  { %v1604_v29 = vunpack.i.h.bf16 %v1602_v28  ;;  %v1603_v30 = vunpack.i.l.bf16 %v1602_v28 }
 0x23e   :  { %v1536_v32 = vpack.c.bf16 %v1604_v29, %v1603_v30 }
 0x240   :  { %1538 = vmatprep.subr.msk.bf16.mxu1 %vm1946_vm2, %v1536_v32 }
 0x241   :  { %1541 = vmatpush3.bf16.xpose.msk.msra.mxu1 %vm1946_vm2, %v1536_v32 }
 0x248   :  { %1457 = vmatmul.mubr.msk.f32.vlgmr.msra.gmra.mrb[0].mxu1 %vm202_vm1, %v1933_v25 }
 0x31b   :  { %v1458_v35 = vpop.f32.mrb[0].mxu1 }
 0x31c   :  { %v283_v36 = vadd.f32 %v1458_v35, %v195_v33  ;;  %v277_v37 = vpop.f32.mrb[1].mxu1  ;;  %v762_v35 = vld [vmem:[#allocation8 + $0x20] sm:$0xff] }
 0x31d   :  { %v278_v38 = vadd.f32 %v277_v37, %v194_v34  ;;  %v763_v34 = vld [vmem:[#allocation8 + $0x28] sm:$0xff] }
 0x31e   :  { %v290_v39 = vsel %vm286_vm3, %v283_v36, -inf }
 0x31f   :  { %291 = vmax.xlane.f32.xlu0 %v290_v39  ;;  %v287_v40 = vsel %vm286_vm3, %v278_v38, -inf }
 0x320   :  { %288 = vmax.xlane.f32.xlu1 %v287_v40 }
 0x331   :  { %401 = vrot.lane.b32.xlu1 %v1933_v25, %s1801_s17 }
 0x335   :  { %1606 = vrot.lane.b32.xlu0 %v1941_v27, %s1802_s18 }
 0x339   :  { %1611 = vrot.lane.b32.xlu0 %v1941_v27, %s1803_s19 }
 0x33d   :  { %399 = vrot.lane.b32.xlu0 %v1935_v26, %s1801_s17 }
 0x341   :  { %1616 = vrot.lane.b32.xlu0 %v1941_v27, %s1804_s20 }
 0x345   :  { %764 = vrot.lane.b32.xlu0 %v1935_v26, %s1805_s22 }
 0x349   :  { %766 = vrot.lane.b32.xlu0 %v1933_v25, %s1805_s22 }
 0x3ac   :  { %v292_v41 = vpop.xlane.xlu0 %291 }
 0x3ad   :  { %v294_v42 = vsub.f32 %v283_v36, %v292_v41  ;;  %v289_v43 = vpop.xlane.xlu1 %288 }
 0x3ae   :  { %v293_v44 = vsub.f32 %v278_v38, %v289_v43 }
 0x3af   :  { %v297_v45 = vmul.f32 1.442695, %v294_v42 }
 0x3b0   :  { %v295_v46 = vmul.f32 1.442695, %v293_v44  ;;  %v1607_v47 = vpop.permute.xlu0 %1606  ;;  %v191_v44 = vld [vmem:[#allocation7 + $0x8] sm:$0xff] }
 0x3b1   :  { %v1609_v48 = vunpack.i.h.bf16 %v1607_v47  ;;  %v1608_v49 = vunpack.i.l.bf16 %v1607_v47  ;;  %v402_v62 = vpop.permute.xlu1 %401 }
 0x3b2   :  { %1644 = vpow2.f32 %v295_v46 }
 0x3b3   :  { %1646 = vpow2.f32 %v297_v45  ;;  %v1542_v50 = vpack.c.bf16 %v1609_v48, %v1608_v49  ;;  %v190_v45 = vld [vmem:[#allocation7] sm:$0xff] }
 0x3b4   :  { %v1612_v51 = vpop.permute.xlu0 %1611 }
 0x3b5   :  { %v1614_v52 = vunpack.i.h.bf16 %v1612_v51  ;;  %v1613_v53 = vunpack.i.l.bf16 %v1612_v51  ;;  %1543 = vmatprep.subr.bf16.mxu1 %v1542_v50 }
 0x3b6   :  { %1545 = vmatpush3.bf16.msra.mxu1 %v1542_v50 }
 0x3b7   :  { %v1546_v54 = vpack.c.bf16 %v1614_v52, %v1613_v53 }
 0x3b8   :  { %v400_v55 = vpop.permute.xlu0 %399 }
 0x3b9   :  { %1548 = vmatprep.subr.msk.bf16.mxu1 %vm1946_vm2, %v1546_v54 }
 0x3bc   :  { %v1645_v56 = vpop.eup %1644  ;;  %v1617_v57 = vpop.permute.xlu0 %1616 }
 0x3bd   :  { %v1647_v58 = vpop.eup %1646  ;;  %v1619_v59 = vunpack.i.h.bf16 %v1617_v57  ;;  %v1618_v60 = vunpack.i.l.bf16 %v1617_v57  ;;  %1463 = vmatprep.mubr.msk.f32.mxu1 %vm286_vm3, %v1645_v56  ;;  %v299_v15 = vsel %vm286_vm3, %v1645_v56, 0.0  ;;  %v1048_v57 = vld [vmem:[#allocation8 + $0x30] sm:$0xff] }
 0x3be   :  { %1464 = vmatmul.mubr.msk.f32.vlgmr.msra.gmra.mrb[2].mxu1 %vm286_vm3, %v1647_v58  ;;  %v302_v16 = vsel %vm286_vm3, %v1647_v58, 0.0 }
 0x3bf   :  { %v1556_v61 = vpack.c.bf16 %v1619_v59, %v1618_v60  ;;  %1551 = vmatpush3.bf16.xpose.msk.msra.mxu1 %vm1946_vm2, %v1546_v54  ;;  %1470 = vmatprep.mubr.msk.f32.mxu1 %vm202_vm1, %v400_v55  ;;  %v1049_v60 = vld [vmem:[#allocation8 + $0x38] sm:$0xff] }
 0x3c0   :  { %v765_v63 = vpop.permute.xlu0 %764 }
 0x3c1   :  { %1558 = vmatprep.subr.msk.bf16.mxu1 %vm1946_vm2, %v1556_v61 }
 0x3c4   :  { %v767_v2 = vpop.permute.xlu0 %766 }
 0x3c6   :  { %1471 = vmatmul.mubr.msk.f32.vlgmr.msra.gmra.mrb[4].mxu1 %vm202_vm1, %v402_v62 }
 0x3c7   :  { %1561 = vmatpush3.bf16.xpose.msk.msra.mxu1 %vm1946_vm2, %v1556_v61  ;;  %1494 = vmatprep.mubr.msk.f32.mxu1 %vm202_vm1, %v765_v63 }
 0x3ce   :  { %1495 = vmatmul.mubr.msk.f32.vlgmr.msra.gmra.mrb[6].mxu1 %vm202_vm1, %v767_v2 }
 0x491   :  { %v1979_v3 = vpop.f32.mrb[2].mxu1 }
 0x492   :  { %v1981_v4 = vpop.f32.mrb[3].mxu1 }
 0x499   :  { %v1472_v7 = vpop.f32.mrb[4].mxu1 }
 0x49a   :  { %v487_v8 = vadd.f32 %v1472_v7, %v398_v5  ;;  %v481_v9 = vpop.f32.mrb[5].mxu1 }
 0x49b   :  { %v482_v10 = vadd.f32 %v481_v9, %v397_v6 }
 0x49c   :  { %v493_v11 = vsel %vm286_vm3, %v487_v8, -inf }
 0x49d   :  { %494 = vmax.xlane.f32.xlu1 %v493_v11  ;;  %v490_v12 = vsel %vm286_vm3, %v482_v10, -inf }
 0x49e   :  { %491 = vmax.xlane.f32.xlu0 %v490_v12 }
 0x4a1   :  { %v1496_v13 = vpop.f32.mrb[6].mxu1 }
 0x4a2   :  { %v846_v14 = vpop.f32.mrb[7].mxu1  ;;  %v852_v38 = vadd.f32 %v1496_v13, %v763_v34 }
 0x4a3   :  { %v847_v40 = vadd.f32 %v846_v14, %v762_v35 }
 0x4a4   :  { %v858_v31 = vsel %vm286_vm3, %v852_v38, -inf }
 0x4a5   :  { %v855_v43 = vsel %vm286_vm3, %v847_v40, -inf }
 0x4ae   :  { %1626 = vrot.lane.b32.xlu1 %v1941_v27, %s1806_s23 }
 0x4b2   :  { %1052 = vrot.lane.b32.xlu1 %v1933_v25, %s1807_s24 }
 0x4b4   :  { %1621 = vrot.lane.b32.xlu0 %v1941_v27, %s1808_s25 }
 0x4b8   :  { %1050 = vrot.lane.b32.xlu0 %v1935_v26, %s1807_s24 }
 0x4d7   :  { %300 = vadd.xlane.f32.xlu0 %v299_v15 }
 0x4db   :  { %303 = vadd.xlane.f32.xlu0 %v302_v16 }
 0x52a   :  { %v495_v17 = vpop.xlane.xlu1 %494 }
 0x52b   :  { %v497_v18 = vsub.f32 %v487_v8, %v495_v17  ;;  %v492_v19 = vpop.xlane.xlu0 %491 }
 0x52c   :  { %v496_v20 = vsub.f32 %v482_v10, %v492_v19 }
 0x52d   :  { %v500_v21 = vmul.f32 1.442695, %v497_v18 }
 0x52e   :  { %v498_v22 = vmul.f32 1.442695, %v496_v20  ;;  %v1627_v23 = vpop.permute.xlu1 %1626 }
 0x52f   :  { %1648 = vpow2.f32 %v500_v21  ;;  %v1629_v24 = vunpack.i.h.bf16 %v1627_v23  ;;  %v1628_v25 = vunpack.i.l.bf16 %v1627_v23  ;;  %v1622_v28 = vpop.permute.xlu0 %1621  ;;  %v192_v21 = vld [vmem:[#allocation7 + $0x10] sm:$0xff] }
 0x530   :  { %1650 = vpow2.f32 %v498_v22  ;;  %v1624_v29 = vunpack.i.h.bf16 %v1622_v28  ;;  %v1623_v26 = vunpack.i.l.bf16 %v1622_v28 }
 0x531   :  { %v1566_v30 = vpack.c.bf16 %v1629_v24, %v1628_v25 }
 0x532   :  { %v1552_v32 = vpack.c.bf16 %v1624_v29, %v1623_v26  ;;  %v1053_v41 = vpop.permute.xlu1 %1052 }
 0x533   :  { %1568 = vmatprep.subr.msk.bf16.mxu1 %vm1946_vm2, %v1566_v30  ;;  %v1051_v33 = vpop.permute.xlu0 %1050 }
 0x534   :  { %1553 = vmatprep.subr.bf16.mxu0 %v1552_v32  ;;  %1571 = vmatpush3.bf16.xpose.msk.msra.mxu1 %vm1946_vm2, %v1566_v30 }
 0x535   :  { %1513 = vmatprep.mubr.msk.f32.mxu1 %vm202_vm1, %v1051_v33  ;;  %1555 = vmatpush3.bf16.msra.mxu0 %v1552_v32 }
 0x536   :  { %1480 = vmatprep.subr.mxu0 %v191_v44 }
 0x539   :  { %v1649_v36 = vpop.eup %1648 }
 0x53a   :  { %v1651_v37 = vpop.eup %1650  ;;  %v505_v39 = vsel %vm286_vm3, %v1649_v36, 0.0 }
 0x53b   :  { %506 = vadd.xlane.f32.xlu1 %v505_v39  ;;  %1477 = vmatprep.mubr.msk.f32.mxu0 %vm286_vm3, %v1651_v37  ;;  %v502_v42 = vsel %vm286_vm3, %v1651_v37, 0.0 }
 0x53c   :  { %1514 = vmatmul.mubr.msk.f32.vlgmr.msra.gmra.mrb[8].mxu1 %vm202_vm1, %v1053_v41  ;;  %503 = vadd.xlane.f32.xlu0 %v502_v42 }
 0x53d   :  { %1478 = vmatmul.mubr.msk.f32.vlgmr.msra.gmra.mrb[2].mxu0 %vm286_vm3, %v1649_v36 }
 0x53e   :  { %1481 = vmatpush3.msra.mxu0 %v191_v44 }
 0x53f   :  { %859 = vmax.xlane.f32.xlu1 %v858_v31  ;;  %1485 = vmatprep.subr.mxu0 %v190_v45 }
 0x540   :  { %856 = vmax.xlane.f32.xlu0 %v855_v43  ;;  %v193_v43 = vld [vmem:[#allocation7 + $0x18] sm:$0xff] }
 0x556   :  { %1631 = vrot.lane.b32.xlu0 %v1941_v27, %s1809_s26 }
 0x564   :  { %v301_v46 = vpop.xlane.xlu0 %300 }
 0x565   :  { %1652 = vrcp.f32 %v301_v46 }
 0x568   :  { %v304_v47 = vpop.xlane.xlu0 %303 }
 0x56f   :  { %v1653_v59 = vpop.eup %1652 }
 0x570   :  { %v394_v13 = vmul.f32 %v1653_v59, %v1981_v4 }
 0x5c8   :  { %v507_v48 = vpop.xlane.xlu1 %506 }
 0x5c9   :  { %v504_v49 = vpop.xlane.xlu0 %503 }
 0x5ca   :  { %1654 = vrcp.f32 %v504_v49 }
 0x5cb   :  { %1656 = vrcp.f32 %v507_v48 }
 0x5cc   :  { %v860_v50 = vpop.xlane.xlu1 %859  ;;  %1658 = vrcp.f32 %v304_v47 }
 0x5cd   :  { %v862_v51 = vsub.f32 %v852_v38, %v860_v50  ;;  %v857_v52 = vpop.xlane.xlu0 %856 }
 0x5ce   :  { %v861_v54 = vsub.f32 %v847_v40, %v857_v52 }
 0x5cf   :  { %v865_v53 = vmul.f32 1.442695, %v862_v51 }
 0x5d0   :  { %v863_v55 = vmul.f32 1.442695, %v861_v54 }
 0x5d1   :  { %1660 = vpow2.f32 %v865_v53  ;;  %v1632_v56 = vpop.permute.xlu0 %1631 }
 0x5d2   :  { %v1634_v2 = vunpack.i.h.bf16 %v1632_v56  ;;  %v1633_v5 = vunpack.i.l.bf16 %v1632_v56  ;;  %1662 = vpow2.f32 %v863_v55 }
 0x5d4   :  { %v1655_v63 = vpop.eup %1654  ;;  %v1562_v14 = vpack.c.bf16 %v1634_v2, %v1633_v5 }
 0x5d5   :  { %v1657_v8 = vpop.eup %1656 }
 0x5d6   :  { %v1659_v15 = vpop.eup %1658 }
 0x5d7   :  { %v395_v18 = vmul.f32 %v1659_v15, %v1979_v3 }
 0x5db   :  { %v1661_v17 = vpop.eup %1660 }
 0x5dc   :  { %v870_v19 = vsel %vm286_vm3, %v1661_v17, 0.0  ;;  %v1663_v20 = vpop.eup %1662 }
 0x5dd   :  { %v867_v4 = vsel %vm286_vm3, %v1663_v20, 0.0 }
 0x60f   :  { %v1515_v58 = vpop.f32.mrb[8].mxu1 }
 0x610   :  { %v1479_v61 = vpop.f32.mrb[2].mxu0  ;;  %v1132_v62 = vpop.f32.mrb[9].mxu1  ;;  %v1138_v10 = vadd.f32 %v1515_v58, %v1049_v60 }
 0x611   :  { %v1133_v6 = vadd.f32 %v1132_v62, %v1048_v57  ;;  %v588_v7 = vpop.f32.mrb[3].mxu0  ;;  %v598_v11 = vmul.f32 %v1657_v8, %v1479_v61 }
 0x612   :  { %v597_v9 = vmul.f32 %v1655_v63, %v588_v7  ;;  %v1144_v16 = vsel %vm286_vm3, %v1138_v10, -inf }
 0x613   :  { %v1141_v12 = vsel %vm286_vm3, %v1133_v6, -inf }
 0x614   :  { %1142 = vmax.xlane.f32.xlu1 %v1141_v12  ;;  %1482 = vmatprep.mubr.msk.f32.mxu0 %vm202_vm1, %v597_v9 }
 0x615   :  { %1483 = vmatmul.mubr.msk.f32.vlgmr.msra.gmra.mrb[4].mxu0 %vm202_vm1, %v598_v11 }
 0x616   :  { %1486 = vmatpush3.msra.mxu0 %v190_v45  ;;  %1487 = vmatprep.mubr.msk.f32.mxu0 %vm202_vm1, %v394_v13 }
 0x617   :  { %1563 = vmatprep.subr.bf16.mxu0 %v1562_v14 }
 0x618   :  { %1145 = vmax.xlane.f32.xlu1 %v1144_v16 }
 0x61c   :  { %871 = vadd.xlane.f32.xlu1 %v870_v19 }
 0x61d   :  { %1488 = vmatmul.mubr.msk.f32.vlgmr.msra.gmra.mrb[4].mxu0 %vm202_vm1, %v395_v18 }
 0x61e   :  { %1565 = vmatpush3.bf16.msra.mxu0 %v1562_v14  ;;  %1501 = vmatprep.mubr.msk.f32.mxu0 %vm286_vm3, %v1663_v20 }
 0x61f   :  { %1504 = vmatprep.subr.mxu0 %v192_v21 }
 0x620   :  { %868 = vadd.xlane.f32.xlu1 %v867_v4 }
 0x621   :  { %1502 = vmatmul.mubr.msk.f32.vlgmr.msra.gmra.mrb[6].mxu0 %vm286_vm3, %v1661_v17 }
 0x622   :  { %1505 = vmatpush3.msra.mxu0 %v192_v21 }
 0x631   :  { %1636 = vrot.lane.b32.xlu1 %v1941_v27, %s1810_s27 }
 0x6a1   :  { %v1143_v3 = vpop.xlane.xlu1 %1142 }
 0x6a2   :  { %v1147_v22 = vsub.f32 %v1133_v6, %v1143_v3 }
 0x6a4   :  { %v1149_v23 = vmul.f32 1.442695, %v1147_v22 }
 0x6a5   :  { %v1146_v24 = vpop.xlane.xlu1 %1145 }
 0x6a6   :  { %1664 = vpow2.f32 %v1149_v23  ;;  %v1148_v25 = vsub.f32 %v1138_v10, %v1146_v24 }
 0x6a8   :  { %v1151_v28 = vmul.f32 1.442695, %v1148_v25 }
 0x6a9   :  { %v872_v29 = vpop.xlane.xlu1 %871 }
 0x6aa   :  { %1666 = vpow2.f32 %v1151_v28 }
 0x6ab   :  { %1668 = vrcp.f32 %v872_v29 }
 0x6ad   :  { %v869_v26 = vpop.xlane.xlu1 %868 }
 0x6ae   :  { %1670 = vrcp.f32 %v869_v26 }
 0x6b0   :  { %v1665_v30 = vpop.eup %1664 }
 0x6b1   :  { %v1637_v32 = vpop.permute.xlu1 %1636  ;;  %v1153_v33 = vsel %vm286_vm3, %v1665_v30, 0.0 }
 0x6b2   :  { %v1639_v34 = vunpack.i.h.bf16 %v1637_v32  ;;  %v1638_v35 = vunpack.i.l.bf16 %v1637_v32  ;;  %1154 = vadd.xlane.f32.xlu0 %v1153_v33 }
 0x6b4   :  { %v1667_v27 = vpop.eup %1666  ;;  %v1572_v36 = vpack.c.bf16 %v1639_v34, %v1638_v35 }
 0x6b5   :  { %v1156_v37 = vsel %vm286_vm3, %v1667_v27, 0.0  ;;  %v1669_v38 = vpop.eup %1668 }
 0x6b6   :  { %1157 = vadd.xlane.f32.xlu1 %v1156_v37  ;;  %1573 = vmatprep.subr.bf16.mxu0 %v1572_v36 }
 0x6b8   :  { %v1671_v40 = vpop.eup %1670 }
 0x6f4   :  { %v1503_v39 = vpop.f32.mrb[6].mxu0 }
 0x6f5   :  { %v963_v41 = vmul.f32 %v1669_v38, %v1503_v39  ;;  %v953_v42 = vpop.f32.mrb[7].mxu0 }
 0x6f6   :  { %v962_v31 = vmul.f32 %v1671_v40, %v953_v42 }
 0x6f8   :  { %1506 = vmatprep.mubr.msk.f32.mxu0 %vm202_vm1, %v962_v31 }
 0x6f9   :  { %1507 = vmatmul.mubr.msk.f32.vlgmr.msra.gmra.mrb[4].mxu0 %vm202_vm1, %v963_v41 }
 0x6fa   :  { %1575 = vmatpush3.bf16.msra.mxu0 %v1572_v36  ;;  %1520 = vmatprep.mubr.msk.f32.mxu0 %vm286_vm3, %v1665_v30 }
 0x6fb   :  { %1523 = vmatprep.subr.mxu0 %v193_v43 }
 0x6fd   :  { %1521 = vmatmul.mubr.msk.f32.vlgmr.msra.gmra.mrb[8].mxu0 %vm286_vm3, %v1667_v27 }
 0x6fe   :  { %1524 = vmatpush3.msra.mxu0 %v193_v43 }
 0x73f   :  { %v1155_v44 = vpop.xlane.xlu0 %1154 }
 0x740   :  { %1672 = vrcp.f32 %v1155_v44 }
 0x743   :  { %v1158_v45 = vpop.xlane.xlu1 %1157 }
 0x744   :  { %1674 = vrcp.f32 %v1158_v45 }
 0x74a   :  { %v1673_v47 = vpop.eup %1672 }
 0x74e   :  { %v1675_v49 = vpop.eup %1674 }
 0x7d0   :  { %v1522_v46 = vpop.f32.mrb[8].mxu0 }
 0x7d1   :  { %v1239_v48 = vpop.f32.mrb[9].mxu0  ;;  %v1249_v51 = vmul.f32 %v1675_v49, %v1522_v46 }
 0x7d2   :  { %v1248_v50 = vmul.f32 %v1673_v47, %v1239_v48 }
 0x7d4   :  { %1525 = vmatprep.mubr.msk.f32.mxu0 %vm202_vm1, %v1248_v50 }
 0x7d5   :  { %1526 = vmatmul.mubr.msk.f32.vlgmr.msra.gmra.mrb[4].mxu0 %vm202_vm1, %v1249_v51 }
 0x8a8   :  { %v1527_v52 = vpop.f32.mrb[4].mxu0 }
 0x8a9   :  { %v1334_v53 = vadd.f32 %v1527_v52, %v1918_v1  ;;  %v1322_v54 = vpop.f32.mrb[5].mxu0 }
 0x8aa   :  { %v1333_v55 = vadd.f32 %v1322_v54, %v1916_v0 }
 0x8ab   :  { %1336 = vst.msk [vmem:[#allocation10 + $0x8] sm:$0xff] %vm80_vm0, %v1334_v53 }
 0x8ac   :  { %1335 = vst.msk [vmem:[#allocation10] sm:$0xff] %vm80_vm0, %v1333_v55 }
 0x8ad   :  { %1775 = shalt.err (!%p1772_p8)
}
 0x8ae   :  { %s1776_s8 = scalar_lea.hbm %s2049_s5, 256 }
 0x8af   :  { %p1777_p9 = scmp.ne.s32.totalorder %s2049_s5, %s1776_s8  ;;  %p1780_p10 = scmp.lt.u32.totalorder %s1776_s8, %s2049_s5 }
 0x8b1   :  { %p1782_p11 = pnand %p1780_p10, %p1777_p9 }
 0x8b3   :  { %1785 = shalt.err (!%p1782_p11)
}
 0x8b4   :  { %1348 = dma.vmem_to_hbm [thread:$0]  %s1343_s29, 256, %s2049_s5, [#allocation4], %s1796_s30, %s1796_s30, %s1797_s6  }
 0x8b5   :  { %1792 = dma.done.wait [#allocation4], 256  }
 0x8b6   :  { %1793 = vsyncadd [#allocation4], 4294967040 }
 0x8b7   :  { %1352 = vsyncpa [#allocation3], 1 }
 0x8b8   :  { %1353 = vsyncpa [#allocation6], 1 }
 0x8b9   :  { %1354 = vsyncpa [#allocation9], 1 }
 0x8ba   :  { %1355 = vsyncpa [#allocation4], 1 }

</bundles_post_ra>
